<compile_context>
chip_gen: v7x
topology: tpu7x:2x2x1
jax: 0.10.0
libtpu: 0.0.40
codegen_flags: <defaults>
</compile_context>

<pallas_src>
import jax
import jax.numpy as jnp
from jax.experimental import pallas as pl
from jax.experimental.pallas import tpu as pltpu

IGNORE_INDEX = -100
NEG_INF = -1.0e30  # finite "minus infinity" (avoids inf-inf NaNs)


def _round_up(x: int, m: int) -> int:
    return ((x + m - 1) // m) * m


# ----------------------------------------------------------------------------
# Fused LM head + cross-entropy kernel.
#
# Grid: (row_blocks, vocab_blocks). For each row block the kernel walks the
# vocab tiles, computing a (tm, tn) logits tile on the MXU and folding it into
# online-softmax accumulators (VMEM scratch, resident across the vocab axis).
# At the last vocab tile it emits the masked per-row loss:
#     per_row = (lse - correct_logit) * (label != IGNORE_INDEX)
# ----------------------------------------------------------------------------
def fused_lmhead_ce_kernel(h_ref, w_ref, b_ref, lab_ref, out_ref,
                           m_sc, l_sc, c_sc):
    j = pl.program_id(1)
    nv = pl.num_programs(1)

    @pl.when(j == 0)
    def _init():
        m_sc[...] = jnp.full_like(m_sc, NEG_INF)
        l_sc[...] = jnp.zeros_like(l_sc)
        c_sc[...] = jnp.full_like(c_sc, NEG_INF)

    # (tm, H) bf16 @ (H, tn) bf16 -> (tm, tn) f32 on the MXU, bias add in f32.
    logits = jnp.dot(h_ref[...], w_ref[...],
                     preferred_element_type=jnp.float32) + b_ref[...]

    labels = lab_ref[...]                                   # (tm, 1) int32
    tn = logits.shape[1]
    # (1, tn) column ids -- broadcasts against (tm, 1) labels in the compare.
    col_ids = jax.lax.broadcasted_iota(jnp.int32, (1, tn), 1) + j * tn

    # Online softmax update.
    m_old = m_sc[...]
    m_new = jnp.maximum(m_old, jnp.max(logits, axis=-1, keepdims=True))
    alpha = jnp.exp(m_old - m_new)
    l_sc[...] = alpha * l_sc[...] + jnp.sum(jnp.exp(logits - m_new),
                                            axis=-1, keepdims=True)
    # Correct-class logit via compare + where + max (no dense one-hot multiply).
    hit = jnp.where(col_ids == labels, logits, NEG_INF)
    c_sc[...] = jnp.maximum(c_sc[...], jnp.max(hit, axis=-1, keepdims=True))
    m_sc[...] = m_new

    @pl.when(j == nv - 1)
    def _finalize():
        lse = m_sc[...] + jnp.log(l_sc[...])                 # (tm, 1)
        per_row = lse - c_sc[...]
        valid = (labels != IGNORE_INDEX).astype(jnp.float32)
        out_ref[...] = per_row * valid                       # 0 for ignored/padded rows


# ----------------------------------------------------------------------------
# Tile selection: tm is the only knob that amortizes the (H, V) weight stream
# (arithmetic intensity == tm FLOPs per weight byte), so keep it as large as
# possible and shrink tn first when VMEM is tight.
# ----------------------------------------------------------------------------
def _pick_tiles(n8, h_pad, v_pad, *, tm_max=1024, tn_max=1024,
                vmem_buf_budget=48 << 20):
    # Vocab tile: largest 128-multiple <= tn_max that divides the padded vocab.
    tn = 128
    for cand in (1024, 512, 256, 128):
        if cand <= tn_max and v_pad % cand == 0:
            tn = cand
            break

    tm = min(_round_up(tm_max, 8), n8)
    # Megacore (v7x): keep >= 2 row blocks when there is enough work to split.
    if n8 >= 1024 and n8 // tm < 2:
        tm = _round_up((n8 + 1) // 2, 8)

    def buf_bytes(tm_, tn_):
        return (2 * tm_ * h_pad * 2      # hidden tile, bf16, double-buffered
                + 2 * h_pad * tn_ * 2    # weight tile, bf16, double-buffered
                + 2 * tn_ * 4            # bias tile, f32
                + 4 * tm_ * 4            # labels + out tiles
                + 3 * tm_ * 4)           # softmax scratch (m, l, correct)

    # Fit buffers in the budget: shrink tn first, then tm.
    while buf_bytes(tm, tn) > vmem_buf_budget and tn > 128:
        tn //= 2
    while buf_bytes(tm, tn) > vmem_buf_budget and tm > 8:
        tm = max(8, _round_up(tm // 2, 8))
    return tm, tn, buf_bytes(tm, tn)


# ----------------------------------------------------------------------------
# One-time LM-head preparation (hoisted out of the per-step path): cast the
# weight to bf16 and pad H/V to lane-aligned shapes. Padded vocab columns get a
# -1e30 bias so they vanish from the softmax.
# ----------------------------------------------------------------------------
def prepare_lm_head(w, b):
    h, v = w.shape
    h_pad = _round_up(h, 128)
    v_pad = _round_up(v, 128)
    w_p = w.astype(jnp.bfloat16)
    if (h_pad, v_pad) != (h, v):
        w_p = jnp.pad(w_p, ((0, h_pad - h), (0, v_pad - v)))
    b_p = b.reshape(1, v).astype(jnp.float32)
    if v_pad != v:
        b_p = jnp.pad(b_p, ((0, 0), (0, v_pad - v)), constant_values=NEG_INF)
    return w_p, b_p


def fused_lm_head_ce(hidden, head, labels, *, tm=1024, tn=1024):
    """Per-row masked next-token CE loss without materializing (N, V) logits.

    hidden: (N, H) rows that feed the loss
    head:   (w_p, b_p) from prepare_lm_head (bf16 padded weight, f32 padded bias)
    labels: (N,) int (IGNORE_INDEX rows are masked out)
    Returns (N,) f32 per-row loss, already multiplied by the valid mask.
    """
    w_p, b_p = head
    h_pad, v_pad = w_p.shape
    n, h = hidden.shape
    n8 = _round_up(n, 8)

    tm, tn, buf_bytes = _pick_tiles(n8, h_pad, v_pad, tm_max=tm, tn_max=tn)
    n_pad = _round_up(n, tm)

    # Activations / labels are padded per call (cheap: no (H, V) traffic here).
    hidden_p = jnp.pad(hidden.astype(jnp.bfloat16),
                       ((0, n_pad - n), (0, h_pad - h)))
    lab_p = jnp.pad(labels.astype(jnp.int32), (0, n_pad - n),
                    constant_values=IGNORE_INDEX).reshape(n_pad, 1)

    row_blocks = n_pad // tm
    grid = (row_blocks, v_pad // tn)

    vmem_limit = min(64 << 20, max(32 << 20, buf_bytes + (8 << 20)))
    cost = pl.CostEstimate(
        flops=2 * n_pad * h_pad * v_pad,
        transcendentals=n_pad * v_pad,
        bytes_accessed=(row_blocks * h_pad * v_pad * 2   # weight re-streamed per row block
                        + n_pad * h_pad * 2              # hidden
                        + n_pad * 8 + v_pad * 4))        # labels + out + bias

    per_tok = pl.pallas_call(
        fused_lmhead_ce_kernel,
        out_shape=jax.ShapeDtypeStruct((n_pad, 1), jnp.float32),
        grid_spec=pltpu.PrefetchScalarGridSpec(
            num_scalar_prefetch=0,
            grid=grid,
            in_specs=[
                pl.BlockSpec((tm, h_pad), lambda i, j: (i, 0)),   # hidden rows
                pl.BlockSpec((h_pad, tn), lambda i, j: (0, j)),   # weight vocab tile
                pl.BlockSpec((1, tn), lambda i, j: (0, j)),       # bias vocab tile
                pl.BlockSpec((tm, 1), lambda i, j: (i, 0)),       # labels
            ],
            out_specs=pl.BlockSpec((tm, 1), lambda i, j: (i, 0)),
            scratch_shapes=[pltpu.VMEM((tm, 1), jnp.float32)] * 3,  # m, l, correct
        ),
        compiler_params=pltpu.CompilerParams(
            dimension_semantics=("parallel", "arbitrary"),
            vmem_limit_bytes=vmem_limit),
        cost_estimate=cost,
    )(hidden_p, w_p, b_p, lab_p)
    return per_tok[:n, 0]


# ----------------------------------------------------------------------------
# TrainingModule forward: loss = CE(model(input)[..., :-1, :], labels[..., 1:])
# ----------------------------------------------------------------------------
def training_module_forward(emb, head, input_ids, labels):
    # Drop the last position BEFORE the matmul: only positions 0..T-2 feed logits.
    hidden = emb[input_ids[:, :-1].reshape(-1)]       # (B*(T-1), H) glue gather
    shifted = labels[:, 1:].reshape(-1)               # (B*(T-1),)

    per_tok = fused_lm_head_ce(hidden, head, shifted)  # masked per-row CE
    count = jnp.sum((shifted != IGNORE_INDEX).astype(jnp.float32))
    return jnp.sum(per_tok) / jnp.maximum(count, 1.0)  # guard all-ignored batches


# ----------------------------------------------------------------------------
def make_params(key, vocab, hidden):
    k1, k2, k3 = jax.random.split(key, 3)
    emb = jax.random.normal(k1, (vocab, hidden), jnp.float32) * 0.02
    w_head = jax.random.normal(k2, (hidden, vocab), jnp.float32) * 0.02
    b_head = jax.random.normal(k3, (1, vocab), jnp.float32) * 0.02
    return emb, w_head, b_head


def reference_forward(params, input_ids, labels, *, bf16_matmul):
    """Pure-JAX reference (optionally using the same bf16 matmul operands)."""
    emb, w_head, b_head = params
    B, T = input_ids.shape
    hidden = emb[input_ids.reshape(-1)]
    if bf16_matmul:
        logits = jnp.dot(hidden.astype(jnp.bfloat16), w_head.astype(jnp.bfloat16),
                         preferred_element_type=jnp.float32) + b_head
    else:
        logits = hidden @ w_head + b_head
    logits = logits.reshape(B, T, -1)[:, :-1, :]
    shifted = labels[:, 1:]
    valid = shifted != IGNORE_INDEX
    # Gather with a clamped index: IGNORE_INDEX (-100) is out of bounds and
    # JAX's fill-mode gather would return NaN, which NaN*0 cannot mask.
    safe = jnp.where(valid, shifted, 0)
    lse = jax.nn.logsumexp(logits, axis=-1)
    correct = jnp.take_along_axis(logits, safe[..., None], axis=-1)[..., 0]
    per = jnp.where(valid, lse - correct, 0.0)
    return jnp.sum(per) / jnp.maximum(jnp.sum(valid.astype(jnp.float32)), 1.0)


if __name__ == "__main__":
    B, T, H, V = 2, 8, 32, 64

    key = jax.random.PRNGKey(0)
    kp, ki, kl = jax.random.split(key, 3)

    params = make_params(kp, V, H)
    emb, w_head, b_head = params
    head = prepare_lm_head(w_head, b_head)   # one-time weight cast+pad (hoisted)

    input_ids = jax.random.randint(ki, (B, T), 0, V, dtype=jnp.int32)
    labels = jax.random.randint(kl, (B, T), 0, V, dtype=jnp.int32)
    # Exercise the ignore_index path.
    labels = labels.at[0, 3].set(IGNORE_INDEX)
    labels = labels.at[1, 7].set(IGNORE_INDEX)

    loss = jax.block_until_ready(training_module_forward(emb, head, input_ids, labels))

    # Tight check vs. a reference using the same bf16 matmul operands.
    ref_bf16 = jax.block_until_ready(
        reference_forward(params, input_ids, labels, bf16_matmul=True))
    assert jnp.allclose(loss, ref_bf16, rtol=1e-4, atol=1e-4), (loss, ref_bf16)

    # Looser check vs. the full-f32 reference (bf16 operand rounding only).
    ref_f32 = jax.block_until_ready(
        reference_forward(params, input_ids, labels, bf16_matmul=False))
    assert jnp.allclose(loss, ref_f32, rtol=2e-2, atol=2e-2), (loss, ref_f32)

    print("KERNEL_OK")
</pallas_src>

<mosaic_0001>
module attributes {stable_mosaic.version = 11 : i64} {
  func.func @fused_lmhead_ce_kernel(%arg0: i32, %arg1: i32, %arg2: memref<16x128xbf16, #tpu.memory_space<vmem>>, %arg3: memref<128x128xbf16, #tpu.memory_space<vmem>>, %arg4: memref<1x128xf32, #tpu.memory_space<vmem>>, %arg5: memref<16x1xi32, #tpu.memory_space<vmem>>, %arg6: memref<16x1xf32, #tpu.memory_space<vmem>>, %arg7: memref<16x1xf32, #tpu.memory_space<vmem>>, %arg8: memref<16x1xf32, #tpu.memory_space<vmem>>, %arg9: memref<16x1xf32, #tpu.memory_space<vmem>>) attributes {dimension_semantics = [#tpu.dimension_semantics<parallel>, #tpu.dimension_semantics<arbitrary>], iteration_bounds = array<i64: 1, 1>, scalar_prefetch = 0 : i64, scratch_operands = 3 : i64, tpu.core_type = #tpu.core_type<tc>, window_params = [{transform_indices = @transform_0, window_bounds = array<i64: 16, 128>}, {transform_indices = @transform_1, window_bounds = array<i64: 128, 128>}, {transform_indices = @transform_2, window_bounds = array<i64: 1, 128>}, {transform_indices = @transform_3, window_bounds = array<i64: 16, 1>}, {transform_indices = @transform_4, window_bounds = array<i64: 16, 1>}]} {
    %c0_i32 = arith.constant 0 : i32
    %0 = arith.cmpi eq, %arg1, %c0_i32 : i32
    %1 = arith.extui %0 : i1 to i32
    %c0_i32_0 = arith.constant 0 : i32
    %2 = arith.cmpi ne, %1, %c0_i32_0 : i32
    scf.if %2 {
      %cst_26 = arith.constant -1.000000e+30 : f32
      %43 = vector.broadcast %cst_26 : f32 to vector<16x1xf32>
      %c0_27 = arith.constant 0 : index
      %c0_28 = arith.constant 0 : index
      %44 = vector.load %arg7[%c0_27, %c0_28] : memref<16x1xf32, #tpu.memory_space<vmem>>, vector<16x1xf32>
      tpu.vector_store %arg7[%c0_27, %c0_28], %43 {strides = array<i32>} : memref<16x1xf32, #tpu.memory_space<vmem>>, vector<16x1xf32>,
      %cst_29 = arith.constant 0.000000e+00 : f32
      %45 = vector.broadcast %cst_29 : f32 to vector<16x1xf32>
      %c0_30 = arith.constant 0 : index
      %c0_31 = arith.constant 0 : index
      %46 = vector.load %arg8[%c0_30, %c0_31] : memref<16x1xf32, #tpu.memory_space<vmem>>, vector<16x1xf32>
      tpu.vector_store %arg8[%c0_30, %c0_31], %45 {strides = array<i32>} : memref<16x1xf32, #tpu.memory_space<vmem>>, vector<16x1xf32>,
      %cst_32 = arith.constant -1.000000e+30 : f32
      %47 = vector.broadcast %cst_32 : f32 to vector<16x1xf32>
      %c0_33 = arith.constant 0 : index
      %c0_34 = arith.constant 0 : index
      %48 = vector.load %arg9[%c0_33, %c0_34] : memref<16x1xf32, #tpu.memory_space<vmem>>, vector<16x1xf32>
      tpu.vector_store %arg9[%c0_33, %c0_34], %47 {strides = array<i32>} : memref<16x1xf32, #tpu.memory_space<vmem>>, vector<16x1xf32>,
    } else {
    }
    %c0 = arith.constant 0 : index
    %c0_1 = arith.constant 0 : index
    %3 = vector.load %arg2[%c0, %c0_1] : memref<16x128xbf16, #tpu.memory_space<vmem>>, vector<16x128xbf16>
    %c0_2 = arith.constant 0 : index
    %c0_3 = arith.constant 0 : index
    %4 = vector.load %arg3[%c0_2, %c0_3] : memref<128x128xbf16, #tpu.memory_space<vmem>>, vector<128x128xbf16>
    %cst = arith.constant dense<0.000000e+00> : vector<16x128xf32>
    %5 = tpu.matmul %3, %4, %cst {dimension_numbers = #tpu.dot_dimension_numbers<[1], [0], [0], [1], [0, 0, 1, 1], [], []>} : vector<16x128xbf16>, vector<128x128xbf16>, vector<16x128xf32> -> vector<16x128xf32>
    %c0_4 = arith.constant 0 : index
    %c0_5 = arith.constant 0 : index
    %6 = vector.load %arg4[%c0_4, %c0_5] : memref<1x128xf32, #tpu.memory_space<vmem>>, vector<1x128xf32>
    %7 = vector.broadcast %6 : vector<1x128xf32> to vector<16x128xf32>
    %8 = arith.addf %5, %7 : vector<16x128xf32>
    %c0_6 = arith.constant 0 : index
    %c0_7 = arith.constant 0 : index
    %9 = vector.load %arg5[%c0_6, %c0_7] : memref<16x1xi32, #tpu.memory_space<vmem>>, vector<16x1xi32>
    %10 = tpu.iota {dimensions = array<i32: 1>} : vector<1x128xi32>
    %c128_i32 = arith.constant 128 : i32
    %11 = arith.muli %arg1, %c128_i32 : i32
    %12 = vector.broadcast %11 : i32 to vector<1x128xi32>
    %13 = arith.addi %10, %12 : vector<1x128xi32>
    %c0_8 = arith.constant 0 : index
    %c0_9 = arith.constant 0 : index
    %14 = vector.load %arg7[%c0_8, %c0_9] : memref<16x1xf32, #tpu.memory_space<vmem>>, vector<16x1xf32>
    %cst_10 = arith.constant dense<0xFF800000> : vector<16xf32>
    %15 = vector.multi_reduction <maximumf>, %8, %cst_10 [1] : vector<16x128xf32> to vector<16xf32>
    %16 = vector.shape_cast %15 : vector<16xf32> to vector<16x1xf32>
    %17 = arith.maximumf %14, %16 : vector<16x1xf32>
    %18 = arith.subf %14, %17 : vector<16x1xf32>
    %19 = math.exp %18 : vector<16x1xf32>
    %c0_11 = arith.constant 0 : index
    %c0_12 = arith.constant 0 : index
    %20 = vector.load %arg8[%c0_11, %c0_12] : memref<16x1xf32, #tpu.memory_space<vmem>>, vector<16x1xf32>
    %21 = arith.mulf %19, %20 : vector<16x1xf32>
    %22 = vector.broadcast %17 : vector<16x1xf32> to vector<16x128xf32>
    %23 = arith.subf %8, %22 : vector<16x128xf32>
    %24 = math.exp %23 : vector<16x128xf32>
    %cst_13 = arith.constant dense<0.000000e+00> : vector<16xf32>
    %25 = vector.multi_reduction <add>, %24, %cst_13 [1] : vector<16x128xf32> to vector<16xf32>
    %26 = vector.shape_cast %25 : vector<16xf32> to vector<16x1xf32>
    %27 = arith.addf %21, %26 : vector<16x1xf32>
    %c0_14 = arith.constant 0 : index
    %c0_15 = arith.constant 0 : index
    %28 = vector.load %arg8[%c0_14, %c0_15] : memref<16x1xf32, #tpu.memory_space<vmem>>, vector<16x1xf32>
    tpu.vector_store %arg8[%c0_14, %c0_15], %27 {strides = array<i32>} : memref<16x1xf32, #tpu.memory_space<vmem>>, vector<16x1xf32>,
    %29 = vector.broadcast %13 : vector<1x128xi32> to vector<16x128xi32>
    %30 = vector.broadcast %9 : vector<16x1xi32> to vector<16x128xi32>
    %31 = arith.cmpi eq, %29, %30 : vector<16x128xi32>
    %cst_16 = arith.constant -1.000000e+30 : f32
    %32 = vector.broadcast %cst_16 : f32 to vector<16x128xf32>
    %33 = arith.select %31, %8, %32 : vector<16x128xi1>, vector<16x128xf32>
    %c0_17 = arith.constant 0 : index
    %c0_18 = arith.constant 0 : index
    %34 = vector.load %arg9[%c0_17, %c0_18] : memref<16x1xf32, #tpu.memory_space<vmem>>, vector<16x1xf32>
    %cst_19 = arith.constant dense<0xFF800000> : vector<16xf32>
    %35 = vector.multi_reduction <maximumf>, %33, %cst_19 [1] : vector<16x128xf32> to vector<16xf32>
    %36 = vector.shape_cast %35 : vector<16xf32> to vector<16x1xf32>
    %37 = arith.maximumf %34, %36 : vector<16x1xf32>
    %c0_20 = arith.constant 0 : index
    %c0_21 = arith.constant 0 : index
    %38 = vector.load %arg9[%c0_20, %c0_21] : memref<16x1xf32, #tpu.memory_space<vmem>>, vector<16x1xf32>
    tpu.vector_store %arg9[%c0_20, %c0_21], %37 {strides = array<i32>} : memref<16x1xf32, #tpu.memory_space<vmem>>, vector<16x1xf32>,
    %c0_22 = arith.constant 0 : index
    %c0_23 = arith.constant 0 : index
    %39 = vector.load %arg7[%c0_22, %c0_23] : memref<16x1xf32, #tpu.memory_space<vmem>>, vector<16x1xf32>
    tpu.vector_store %arg7[%c0_22, %c0_23], %17 {strides = array<i32>} : memref<16x1xf32, #tpu.memory_space<vmem>>, vector<16x1xf32>,
    %c0_i32_24 = arith.constant 0 : i32
    %40 = arith.cmpi eq, %arg1, %c0_i32_24 : i32
    %41 = arith.extui %40 : i1 to i32
    %c0_i32_25 = arith.constant 0 : i32
    %42 = arith.cmpi ne, %41, %c0_i32_25 : i32
    scf.if %42 {
      %c0_26 = arith.constant 0 : index
      %c0_27 = arith.constant 0 : index
      %43 = vector.load %arg7[%c0_26, %c0_27] : memref<16x1xf32, #tpu.memory_space<vmem>>, vector<16x1xf32>
      %c0_28 = arith.constant 0 : index
      %c0_29 = arith.constant 0 : index
      %44 = vector.load %arg8[%c0_28, %c0_29] : memref<16x1xf32, #tpu.memory_space<vmem>>, vector<16x1xf32>
      %45 = math.log %44 : vector<16x1xf32>
      %46 = arith.addf %43, %45 : vector<16x1xf32>
      %c0_30 = arith.constant 0 : index
      %c0_31 = arith.constant 0 : index
      %47 = vector.load %arg9[%c0_30, %c0_31] : memref<16x1xf32, #tpu.memory_space<vmem>>, vector<16x1xf32>
      %48 = arith.subf %46, %47 : vector<16x1xf32>
      %c-100_i32 = arith.constant -100 : i32
      %49 = vector.broadcast %c-100_i32 : i32 to vector<16x1xi32>
      %50 = arith.cmpi ne, %9, %49 : vector<16x1xi32>
      %51 = arith.extui %50 : vector<16x1xi1> to vector<16x1xi32>
      %52 = arith.sitofp %51 : vector<16x1xi32> to vector<16x1xf32>
      %53 = arith.mulf %48, %52 : vector<16x1xf32>
      %c0_32 = arith.constant 0 : index
      %c0_33 = arith.constant 0 : index
      %54 = vector.load %arg6[%c0_32, %c0_33] : memref<16x1xf32, #tpu.memory_space<vmem>>, vector<16x1xf32>
      tpu.vector_store %arg6[%c0_32, %c0_33], %53 {strides = array<i32>} : memref<16x1xf32, #tpu.memory_space<vmem>>, vector<16x1xf32>,
    } else {
    }
    return
  }
  func.func @transform_0(%arg0: i32, %arg1: i32) -> (i32, i32) {
    %c0_i32 = arith.constant 0 : i32
    %c0_i32_0 = arith.constant 0 : i32
    return %arg0, %c0_i32 : i32, i32
  }
  func.func @transform_1(%arg0: i32, %arg1: i32) -> (i32, i32) {
    %c0_i32 = arith.constant 0 : i32
    %c0_i32_0 = arith.constant 0 : i32
    return %c0_i32, %arg1 : i32, i32
  }
  func.func @transform_2(%arg0: i32, %arg1: i32) -> (i32, i32) {
    %c0_i32 = arith.constant 0 : i32
    %c0_i32_0 = arith.constant 0 : i32
    return %c0_i32, %arg1 : i32, i32
  }
  func.func @transform_3(%arg0: i32, %arg1: i32) -> (i32, i32) {
    %c0_i32 = arith.constant 0 : i32
    %c0_i32_0 = arith.constant 0 : i32
    return %arg0, %c0_i32 : i32, i32
  }
  func.func @transform_4(%arg0: i32, %arg1: i32) -> (i32, i32) {
    %c0_i32 = arith.constant 0 : i32
    %c0_i32_0 = arith.constant 0 : i32
    return %arg0, %c0_i32 : i32, i32
  }
}

</mosaic_0001>

<bundles_post_ra>
// kernel: tpu_custom_call.1
= control target key start
LH: loop header
LB: loop body
LE: loop exit
PB: predicated region body
PF: predicated region fallthrough
CT: control target
= control target key end

     0   :  { %9 = vsyncpa [#allocation6], 0  ;;  %s362_s15 = smov [#allocation5]   ;;  %s459_s0 = inlined_call_operand.vmem [shape: bf16[16,128], index: 0, kind: input, shape index: {}]   ;;  %s460_s1 = inlined_call_operand.hbm [shape: bf16[128,128], index: 1, kind: input, shape index: {}]   ;;  %s461_s2 = inlined_call_operand.vmem [shape: f32[1,128], index: 2, kind: input, shape index: {}]   ;;  %s462_s3 = inlined_call_operand.vmem [shape: s32[16,1], index: 3, kind: input, shape index: {}]   ;;  %s463_s4 = inlined_call_operand.vmem [shape: f32[16,1], index: 4, kind: output, shape index: {}]  }
   0x1   :  { %s17_s16 = sshll.u32 %s362_s15, 4  ;;  %s338_s19 = scalar_lea.hbm %s460_s1, 1024  ;;  %s18_s16 = int_to_ptr.vmem [resolvable:$true] %s17_s16 }
   0x2   :  { %p339_p0 = scmp.ne.s32.totalorder %s460_s1, %s338_s19  ;;  %p342_p1 = scmp.lt.u32.totalorder %s338_s19, %s460_s1 }
   0x4   :  { %p344_p2 = pnand %p342_p1, %p339_p0 }
   0x6   :  { %347 = shalt.err (!%p344_p2)
}
   0x7   :  { %s348_s24 = scalar_lea.vmem %s18_s16, 1024  ;;  %p353_p4 = scmp.lt.s32.totalorder %s18_s16, %s18_s16 }
   0x8   :  { %p349_p3 = scmp.ne.s32.totalorder %s18_s16, %s348_s24  ;;  %p354_p5 = scmp.lt.s32.totalorder %s348_s24, %s348_s24 }
   0xa   :  { %p355_p6 = por %p354_p5, %p353_p4 }
   0xc   :  { %p356_p7 = pnand %p355_p6, %p349_p3 }
   0xe   :  { %359 = shalt.err (!%p356_p7)
}
   0xf   :  { %s363_s25 = smov 64   ;;  %s364_s26 = smov 4  }
  0x10   :  { %23 = dma.hbm_to_vmem [thread:$0]  %s460_s1, 1024, %s18_s16, [#allocation6], %s363_s25, %s363_s25, %s364_s26  }
  0x11   :  { %360 = dma.done.wait [#allocation6], 1024  }
  0x12   :  { %361 = vsyncadd [#allocation6], 4294966272  ;;  %v365_v0 = vmov 0.0   ;;  %vm366_vm0 = vmmov 0   ;;  %v317_v1 = vld [vmem:[#allocation5] sm:$0xff]   ;;  %v318_v2 = vld [vmem:[#allocation5 + $0x8] sm:$0xff]   ;;  %v165_v27 = vlaneseq }
  0x13   :  { %288 = vmatprep.subr.bf16.mxu0 %v365_v0  ;;  %304 = vmatprep.mubr.msk.bf16.mxu0 %vm366_vm0, %v365_v0  ;;  %v319_v3 = vld [vmem:[#allocation5 + $0x10] sm:$0xff]   ;;  %v320_v4 = vld [vmem:[#allocation5 + $0x18] sm:$0xff]   ;;  %v321_v5 = vld [vmem:[#allocation5 + $0x20] sm:$0xff]   ;;  %v367_v10 = vmov 0   ;;  %vm36_vm1 = vcmask 7168  }
  0x14   :  { %289 = vmatpush3.bf16.msra.mxu0 %v317_v1  ;;  %v322_v6 = vld [vmem:[#allocation5 + $0x28] sm:$0xff]   ;;  %v323_v7 = vld [vmem:[#allocation5 + $0x30] sm:$0xff]   ;;  %v324_v8 = vld [vmem:[#allocation5 + $0x38] sm:$0xff]   ;;  %316 = vset.pattern.permute.xlu0 %v367_v10  ;;  %v368_v11 = vmov -1e+30   ;;  %39 = vst.msk [vmem:[#allocation3] sm:$0xff] %vm36_vm1, %v365_v0 }
  0x15   :  { %290 = vmatprep.subr.bf16.mxu0 %v365_v0  ;;  %v325_v9 = vld [vmem:[%s459_s0] sm:$0xff]   ;;  %315 = vset.pattern.permute.xlu1 %v367_v10  ;;  %37 = vst.msk [vmem:[#allocation2] sm:$0xff] %vm36_vm1, %v368_v11  ;;  %38 = vst.msk [vmem:[#allocation2 + $0x8] sm:$0xff] %vm36_vm1, %v368_v11  ;;  %v440_v29 = vld [vmem:[%s462_s3 + $0x8] sm:$0xff]  ;;  %v166_v30 = vand.u32 127, %v165_v27 }
  0x16   :  { %40 = vst.msk [vmem:[#allocation3 + $0x8] sm:$0xff] %vm36_vm1, %v365_v0  ;;  %41 = vst.msk [vmem:[#allocation4] sm:$0xff] %vm36_vm1, %v368_v11  ;;  %v267_v12 = vld [vmem:[%s461_s2] ss:$0 sm:$0xff]  ;;  %vm253_vm5 = vcmp.ne.s32.totalorder %v440_v29, 4294967196 }
  0x17   :  { %42 = vst.msk [vmem:[#allocation4 + $0x8] sm:$0xff] %vm36_vm1, %v368_v11  ;;  %v432_v19 = vld [vmem:[%s462_s3] sm:$0xff] }
  0x18   :  { %291 = vmatpush3.bf16.msra.mxu0 %v318_v2  ;;  %vm252_vm4 = vcmp.ne.s32.totalorder %v432_v19, 4294967196 }
  0x19   :  { %292 = vmatprep.subr.bf16.mxu0 %v365_v0 }
  0x1b   :  { %v184_v49 = vld [vmem:[#allocation3] sm:$0xff] }
  0x1c   :  { %293 = vmatpush3.bf16.msra.mxu0 %v319_v3  ;;  %v170_v20 = vld [vmem:[#allocation2] sm:$0xff]  ;;  %v171_v23 = vld [vmem:[#allocation2 + $0x8] sm:$0xff] }
  0x1d   :  { %294 = vmatprep.subr.bf16.mxu0 %v365_v0  ;;  %v223_v43 = vld [vmem:[#allocation4] sm:$0xff]  ;;  %v185_v53 = vld [vmem:[#allocation3 + $0x8] sm:$0xff] }
  0x1e   :  { %v224_v58 = vld [vmem:[#allocation4 + $0x8] sm:$0xff] }
  0x20   :  { %295 = vmatpush3.bf16.msra.mxu0 %v320_v4 }
  0x21   :  { %296 = vmatprep.subr.bf16.mxu0 %v365_v0 }
  0x24   :  { %297 = vmatpush3.bf16.msra.mxu0 %v321_v5  ;;  %v277_v5 = vsel %vm252_vm4, 1.0, %v365_v0 }
  0x25   :  { %298 = vmatprep.subr.bf16.mxu0 %v365_v0 }
  0x28   :  { %299 = vmatpush3.bf16.msra.mxu0 %v322_v6 }
  0x29   :  { %300 = vmatprep.subr.bf16.mxu0 %v365_v0 }
  0x2c   :  { %301 = vmatpush3.bf16.msra.mxu0 %v323_v7 }
  0x2d   :  { %302 = vmatprep.subr.bf16.mxu0 %v365_v0 }
  0x30   :  { %303 = vmatpush3.bf16.msra.mxu0 %v324_v8 }
  0x33   :  { %305 = vmatmul.mubr.bf16.vlgmr.msra.gmra.mrb[0].mxu0 %v325_v9 }
 0x106   :  { %v156_v13 = vpop.f32.mrb[0].mxu0 }
 0x107   :  { %v157_v14 = vadd.f32 %v267_v12, %v156_v13  ;;  %v306_v15 = vpop.f32.mrb[1].mxu0 }
 0x108   :  { %v159_v16 = vpop.f32.mrb[2].mxu0 }
 0x109   :  { %172 = vmax.xlane.f32.xlu0 %v157_v14  ;;  %v307_v17 = vpop.f32.mrb[3].mxu0  ;;  %v160_v18 = vadd.f32 %v267_v12, %v159_v16  ;;  %v278_v12 = vsel %vm253_vm5, 1.0, %v365_v0 }
 0x10d   :  { %174 = vmax.xlane.f32.xlu0 %v160_v18 }
 0x123   :  { %214 = vperm.xlu0 %316, %v432_v19  }
 0x196   :  { %v173_v21 = vpop.xlane.xlu0 %172 }
 0x197   :  { %v176_v22 = vmax.f32 %v170_v20, %v173_v21 }
 0x199   :  { %v178_v24 = vsub.f32 %v170_v20, %v176_v22  ;;  %233 = vst.msk [vmem:[#allocation2] sm:$0xff] %vm36_vm1, %v176_v22  ;;  %190 = vperm.xlu1 %315, %v176_v22  }
 0x19a   :  { %v175_v25 = vpop.xlane.xlu0 %174 }
 0x19b   :  { %v177_v26 = vmax.f32 %v171_v23, %v175_v25  ;;  %v180_v46 = vmul.f32 1.442695, %v178_v24 }
 0x19d   :  { %v179_v28 = vsub.f32 %v171_v23, %v177_v26  ;;  %234 = vst.msk [vmem:[#allocation2 + $0x8] sm:$0xff] %vm36_vm1, %v177_v26  ;;  %195 = vperm.xlu1 %315, %v177_v26  }
 0x19f   :  { %v182_v47 = vmul.f32 1.442695, %v179_v28 }
 0x1a0   :  { %v238_v2 = vld [vmem:[#allocation2] sm:$0xff] }
 0x1a1   :  { %217 = vperm.xlu1 %315, %v440_v29  }
 0x1a2   :  { %v215_v31 = vpop.permute.xlu0 %214 }
 0x1a3   :  { %vm219_vm2 = vcmp.eq.s32.totalorder %v166_v30, %v215_v31 }
 0x1a4   :  { %v221_v32 = vsel %vm219_vm2, %v157_v14, -1e+30  ;;  %v239_v9 = vld [vmem:[#allocation2 + $0x8] sm:$0xff] }
 0x1a5   :  { %225 = vmax.xlane.f32.xlu0 %v221_v32 }
 0x218   :  { %v191_v33 = vpop.permute.xlu1 %190 }
 0x219   :  { %v198_v34 = vsub.f32 %v157_v14, %v191_v33 }
 0x21b   :  { %v200_v35 = vmul.f32 1.442695, %v198_v34 }
 0x21c   :  { %v196_v36 = vpop.permute.xlu1 %195 }
 0x21d   :  { %326 = vpow2.f32 %v200_v35  ;;  %v199_v37 = vsub.f32 %v160_v18, %v196_v36 }
 0x21f   :  { %v202_v38 = vmul.f32 1.442695, %v199_v37 }
 0x220   :  { %v218_v40 = vpop.permute.xlu1 %217 }
 0x221   :  { %328 = vpow2.f32 %v202_v38  ;;  %vm220_vm3 = vcmp.eq.s32.totalorder %v166_v30, %v218_v40 }
 0x222   :  { %v222_v42 = vsel %vm220_vm3, %v160_v18, -1e+30  ;;  %330 = vpow2.f32 %v180_v46 }
 0x223   :  { %332 = vpow2.f32 %v182_v47 }
 0x227   :  { %v327_v39 = vpop.eup %326 }
 0x228   :  { %204 = vadd.xlane.f32.xlu1 %v327_v39 }
 0x22b   :  { %v329_v41 = vpop.eup %328 }
 0x22c   :  { %206 = vadd.xlane.f32.xlu1 %v329_v41  ;;  %v331_v48 = vpop.eup %330 }
 0x22d   :  { %v186_v50 = vmul.f32 %v331_v48, %v184_v49  ;;  %v333_v51 = vpop.eup %332 }
 0x22e   :  { %v187_v55 = vmul.f32 %v333_v51, %v185_v53 }
 0x230   :  { %227 = vmax.xlane.f32.xlu1 %v222_v42 }
 0x232   :  { %v226_v44 = vpop.xlane.xlu0 %225 }
 0x233   :  { %v229_v45 = vmax.f32 %v223_v43, %v226_v44 }
 0x235   :  { %231 = vst.msk [vmem:[#allocation4] sm:$0xff] %vm36_vm1, %v229_v45 }
 0x23c   :  { %v248_v6 = vld [vmem:[#allocation4] sm:$0xff] }
 0x2b5   :  { %v205_v52 = vpop.xlane.xlu1 %204 }
 0x2b6   :  { %v208_v54 = vadd.f32 %v205_v52, %v186_v50 }
 0x2b8   :  { %211 = vst.msk [vmem:[#allocation3] sm:$0xff] %vm36_vm1, %v208_v54 }
 0x2b9   :  { %v207_v56 = vpop.xlane.xlu1 %206 }
 0x2ba   :  { %v209_v57 = vadd.f32 %v207_v56, %v187_v55 }
 0x2bc   :  { %212 = vst.msk [vmem:[#allocation3 + $0x8] sm:$0xff] %vm36_vm1, %v209_v57 }
 0x2bd   :  { %v228_v59 = vpop.xlane.xlu1 %227 }
 0x2be   :  { %v230_v60 = vmax.f32 %v224_v58, %v228_v59 }
 0x2bf   :  { %v240_v61 = vld [vmem:[#allocation3] sm:$0xff] }
 0x2c0   :  { %334 = vlog2.f32 %v240_v61  ;;  %232 = vst.msk [vmem:[#allocation4 + $0x8] sm:$0xff] %vm36_vm1, %v230_v60 }
 0x2c3   :  { %v241_v62 = vld [vmem:[#allocation3 + $0x8] sm:$0xff] }
 0x2c4   :  { %336 = vlog2.f32 %v241_v62 }
 0x2c7   :  { %v249_v13 = vld [vmem:[#allocation4 + $0x8] sm:$0xff] }
 0x2ca   :  { %v335_v63 = vpop.eup %334 }
 0x2cb   :  { %v243_v1 = vmul.f32 0.6931472, %v335_v63 }
 0x2cd   :  { %v246_v3 = vadd.f32 %v243_v1, %v238_v2 }
 0x2ce   :  { %v337_v4 = vpop.eup %336 }
 0x2cf   :  { %v250_v7 = vsub.f32 %v246_v3, %v248_v6  ;;  %v245_v8 = vmul.f32 0.6931472, %v337_v4 }
 0x2d1   :  { %v258_v10 = vmul.f32 %v277_v5, %v250_v7  ;;  %v247_v11 = vadd.f32 %v245_v8, %v239_v9 }
 0x2d3   :  { %260 = vst.msk [vmem:[%s463_s4] sm:$0xff] %vm36_vm1, %v258_v10  ;;  %v251_v14 = vsub.f32 %v247_v11, %v249_v13 }
 0x2d5   :  { %v259_v15 = vmul.f32 %v278_v12, %v251_v14 }
 0x2d7   :  { %261 = vst.msk [vmem:[%s463_s4 + $0x8] sm:$0xff] %vm36_vm1, %v259_v15 }
 0x2d8   :  { %266 = vsyncpa [#allocation6], 1 }

</bundles_post_ra>
